<compile_context>
chip_gen: v7x
topology: tpu7x:2x2x1
jax: 0.10.0
libtpu: 0.0.40
codegen_flags: <defaults>
</compile_context>

<pallas_src>
import math
from functools import partial

import jax
import jax.numpy as jnp
from jax.experimental import pallas as pl
from jax.experimental.pallas import tpu as pltpu


def _round_up(a, b):
    return (a + b - 1) // b * b


# ----------------------------- kernels ------------------------------------- #

def _lora_kernel(x_ref, a_ref, b_ref, o_ref, *, scaling):
    # x_ref: (tm, in_dim)  a_ref: (in_dim, r)  b_ref: (r, in_dim)  o_ref: (tm, in_dim)
    x = x_ref[...]
    h = jnp.dot(x, a_ref[...], preferred_element_type=jnp.float32)        # (tm, r)
    # Scale the small (tm, r) intermediate (in_dim/r x fewer VPU ops than scaling
    # the output) and cast back to the MXU-native input dtype for the 2nd matmul.
    h = (h * scaling).astype(x.dtype)
    y = jnp.dot(h, b_ref[...], preferred_element_type=jnp.float32)        # (tm, in_dim)
    o_ref[...] = y.astype(o_ref.dtype)


def _lora_fused_kernel(x_ref, a_ref, b_ref, base_ref, o_ref, *, scaling):
    # Same as above, but adds the LoRA delta onto `base` (aliased with the output).
    x = x_ref[...]
    h = jnp.dot(x, a_ref[...], preferred_element_type=jnp.float32)
    h = (h * scaling).astype(x.dtype)
    y = jnp.dot(h, b_ref[...], preferred_element_type=jnp.float32)
    if o_ref.dtype == jnp.float32:
        o_ref[...] = base_ref[...] + y
    else:
        # bf16 epilogue: skip the full-tile f32 upcast/downcast of base.
        o_ref[...] = base_ref[...] + y.astype(o_ref.dtype)


def _lora_kernel_2d(x_ref, a_ref, b_ref, o_ref, h_ref, *, scaling):
    # x_ref: (tm, in_dim)  a_ref: (in_dim, r)  b_ref: (r, tn)  o_ref: (tm, tn)
    # h_ref: (tm, r) VMEM scratch carrying (x @ A) * scaling across the j axis.
    @pl.when(pl.program_id(1) == 0)
    def _():
        h = jnp.dot(x_ref[...], a_ref[...], preferred_element_type=jnp.float32)
        h_ref[...] = (h * scaling).astype(h_ref.dtype)

    y = jnp.dot(h_ref[...], b_ref[...], preferred_element_type=jnp.float32)
    o_ref[...] = y.astype(o_ref.dtype)


def _lora_fused_kernel_2d(x_ref, a_ref, b_ref, base_ref, o_ref, h_ref, *, scaling):
    @pl.when(pl.program_id(1) == 0)
    def _():
        h = jnp.dot(x_ref[...], a_ref[...], preferred_element_type=jnp.float32)
        h_ref[...] = (h * scaling).astype(h_ref.dtype)

    y = jnp.dot(h_ref[...], b_ref[...], preferred_element_type=jnp.float32)
    if o_ref.dtype == jnp.float32:
        o_ref[...] = base_ref[...] + y
    else:
        o_ref[...] = base_ref[...] + y.astype(o_ref.dtype)


# ----------------------------- tile sizing ---------------------------------- #

def _vmem_budget_bytes():
    """Per-generation VMEM budget: ~80% of physical (leave compiler scratch room)."""
    cap = 64 << 20                       # conservative default (v7x per-TC VMEM)
    try:
        info = pltpu.get_tpu_info()
        cap = int(getattr(info, "vmem_capacity_bytes", cap)) or cap
    except Exception:
        pass
    return max(int(cap * 0.80), 16 << 20)


def _choose_tm(M, in_dim, r, itemsize, n_streams, budget):
    """Row-tile size for the 1-D (untiled-in_dim) path."""
    cap = 1024 if itemsize >= 4 else 2048
    weights = 2 * (2 * in_dim * r * itemsize)          # A + B, runtime double-buffers
    per_row = (n_streams * 2 * in_dim * itemsize       # x / out (/ base) tiles, 2 bufs each
               + in_dim * 4                            # f32 second-matmul result temp
               + r * 4)                                # f32 (x @ A) temp
    avail = max(budget - weights, 8 * per_row)
    tm = int(min(avail // per_row, cap))
    tm = max(8, tm - tm % 8)
    if M <= 8:
        return int(M)
    # Guarantee >= 4 grid steps (>= 2 per v7x TensorCore) so DMA overlaps compute.
    tm = min(tm, _round_up(pl.cdiv(M, 4), 8))
    return max(8, int(tm))


def _choose_tm_2d(M, in_dim, r, tn, itemsize, n_streams, budget):
    """Row-tile size for the 2-D (row, N)-tiled path."""
    cap = 1024 if itemsize >= 4 else 2048
    weights = 2 * (in_dim * r + r * tn) * itemsize     # A + B-tile, double-buffered
    per_row = (2 * in_dim * itemsize                   # x tile (double-buffered)
               + (n_streams - 1) * 2 * tn * itemsize   # out (/ base) tiles
               + tn * 4                                # f32 result temp
               + r * itemsize + r * 4)                 # h scratch + f32 h temp
    avail = max(budget - weights, 8 * per_row)
    tm = int(min(avail // per_row, cap))
    tm = max(8, tm - tm % 8)
    if M <= 8:
        return int(M)
    # The j axis already provides >= 2 steps per row-tile; keep >= 2 row tiles for
    # megacore balance on the parallel i axis.
    tm = min(tm, _round_up(pl.cdiv(M, 2), 8))
    return max(8, int(tm))


# ----------------------------- wrapper -------------------------------------- #

def lora_forward(x, lora_A, lora_B, *, alpha=1.0, base=None, tm=None, tn=None):
    """LoRA forward: (x @ lora_A @ lora_B) * (alpha / r)  [+ base, if given].

    x:      (..., in_dim)          (bf16 recommended in production: memory-bound op)
    lora_A: (in_dim, r)
    lora_B: (r, in_dim)
    base:   optional (..., in_dim) residual; fused add with output aliasing.
    tm/tn:  optional tile overrides (tn enables the N-tiled path).
    """
    in_dim, r = lora_A.shape
    scaling = float(alpha) / float(r)          # matches the PyTorch module for alpha=1

    orig_shape = x.shape
    x2d = x.reshape(-1, in_dim)
    M = x2d.shape[0]
    itemsize = jnp.dtype(x.dtype).itemsize
    n_streams = 2 if base is None else 3       # x + out (+ base)
    budget = _vmem_budget_bytes()

    # Auto-select the N-tiled path only when the untiled-in_dim path would squeeze
    # the row tile too hard (e.g. huge in_dim under v7x's 64 MiB VMEM).
    if tn is None and tm is None and in_dim % 128 == 0 and in_dim >= 2048:
        if _choose_tm(M, in_dim, r, itemsize, n_streams, budget) < 256:
            tn = min(in_dim, 512)

    base2d = None
    if base is not None:
        base2d = base.reshape(-1, in_dim).astype(x.dtype)

    # Memory-bound op (arithmetic intensity ~ r/2 flop/byte): tell XLA.
    bytes_accessed = (n_streams * M * in_dim + 2 * in_dim * r) * itemsize
    cost = pl.CostEstimate(flops=4 * M * in_dim * r,
                           transcendentals=0,
                           bytes_accessed=bytes_accessed)
    cparams = pltpu.CompilerParams(
        dimension_semantics=("parallel",) if tn is None else ("parallel", "arbitrary"),
        vmem_limit_bytes=budget,               # same number the tile sizing used
    )
    out_shape = jax.ShapeDtypeStruct((M, in_dim), x.dtype)

    if tn is None:
        # ------------- 1-D row-tiled path (in_dim untiled -> lane-dense stores) ----
        if tm is None:
            tm = _choose_tm(M, in_dim, r, itemsize, n_streams, budget)
        tm = int(tm)
        if tm >= M:
            tm = M                             # full-extent block is always legal
        else:
            tm = max(8, tm - tm % 8)           # sub-tiles must obey the 8-row rule
        grid = (pl.cdiv(M, tm),)               # ragged last tile handled by Pallas

        x_spec = pl.BlockSpec((tm, in_dim), lambda i: (i, 0))
        a_spec = pl.BlockSpec((in_dim, r), lambda i: (0, 0))    # resident, DMA'd once
        b_spec = pl.BlockSpec((r, in_dim), lambda i: (0, 0))    # resident, DMA'd once
        o_spec = pl.BlockSpec((tm, in_dim), lambda i: (i, 0))   # lane-dense output

        if base is None:
            out = pl.pallas_call(
                partial(_lora_kernel, scaling=scaling),
                out_shape=out_shape,
                grid_spec=pltpu.PrefetchScalarGridSpec(
                    num_scalar_prefetch=0, grid=grid,
                    in_specs=[x_spec, a_spec, b_spec],
                    out_specs=o_spec),
                compiler_params=cparams, cost_estimate=cost,
            )(x2d, lora_A, lora_B)
        else:
            out = pl.pallas_call(
                partial(_lora_fused_kernel, scaling=scaling),
                out_shape=out_shape,
                grid_spec=pltpu.PrefetchScalarGridSpec(
                    num_scalar_prefetch=0, grid=grid,
                    in_specs=[x_spec, a_spec, b_spec, o_spec],
                    out_specs=o_spec),
                compiler_params=cparams, cost_estimate=cost,
                input_output_aliases={3: 0},           # base buffer reused as output
            )(x2d, lora_A, lora_B, base2d)
    else:
        # ------------- 2-D (row, N)-tiled path for very large in_dim ---------------
        tn = int(tn)
        tn = in_dim if tn >= in_dim else max(128, tn - tn % 128)
        if tm is None:
            tm = _choose_tm_2d(M, in_dim, r, tn, itemsize, n_streams, budget)
        tm = int(tm)
        if tm >= M:
            tm = M
        else:
            tm = max(8, tm - tm % 8)
        grid = (pl.cdiv(M, tm), pl.cdiv(in_dim, tn))

        x_spec = pl.BlockSpec((tm, in_dim), lambda i, j: (i, 0))   # DMA'd once per i
        a_spec = pl.BlockSpec((in_dim, r), lambda i, j: (0, 0))
        b_spec = pl.BlockSpec((r, tn), lambda i, j: (0, j))
        o_spec = pl.BlockSpec((tm, tn), lambda i, j: (i, j))
        scratch = [pltpu.VMEM((tm, r), x.dtype)]

        if base is None:
            out = pl.pallas_call(
                partial(_lora_kernel_2d, scaling=scaling),
                out_shape=out_shape,
                grid_spec=pltpu.PrefetchScalarGridSpec(
                    num_scalar_prefetch=0, grid=grid,
                    in_specs=[x_spec, a_spec, b_spec],
                    out_specs=o_spec, scratch_shapes=scratch),
                compiler_params=cparams, cost_estimate=cost,
            )(x2d, lora_A, lora_B)
        else:
            out = pl.pallas_call(
                partial(_lora_fused_kernel_2d, scaling=scaling),
                out_shape=out_shape,
                grid_spec=pltpu.PrefetchScalarGridSpec(
                    num_scalar_prefetch=0, grid=grid,
                    in_specs=[x_spec, a_spec, b_spec, o_spec],
                    out_specs=o_spec, scratch_shapes=scratch),
                compiler_params=cparams, cost_estimate=cost,
                input_output_aliases={3: 0},
            )(x2d, lora_A, lora_B, base2d)

    return out.reshape(orig_shape)


# ----------------------------- init (module-faithful) ----------------------- #

def init_lora_params(key, in_dim, bottle_dim, dtype=jnp.float32):
    # nn.init.kaiming_uniform_(A, a=sqrt(5)) on (in_dim, bottle_dim):
    #   fan_in = bottle_dim, gain = sqrt(2/(1+5)) = sqrt(1/3),
    #   bound = gain * sqrt(3/fan_in)
    fan_in = bottle_dim
    gain = math.sqrt(2.0 / (1.0 + 5.0))
    bound = gain * math.sqrt(3.0 / fan_in)
    lora_A = jax.random.uniform(
        key, (in_dim, bottle_dim), dtype=dtype, minval=-bound, maxval=bound)
    lora_B = jnp.zeros((bottle_dim, in_dim), dtype=dtype)    # zero-init per module
    return lora_A, lora_B


# ----------------------------- test ----------------------------------------- #

if __name__ == "__main__":
    key = jax.random.PRNGKey(0)
    kx, ka, kb, kbase, kx2, kb2 = jax.random.split(key, 6)

    batch, seq, in_dim, bottle_dim = 2, 8, 32, 8
    scaling = 1.0 / bottle_dim

    x = jax.random.normal(kx, (batch, seq, in_dim), dtype=jnp.float32)

    def ref_lora(x_, A_, B_, scale):
        h = jnp.matmul(x_.astype(jnp.float32), A_.astype(jnp.float32), precision="highest")
        y = jnp.matmul(h, B_.astype(jnp.float32), precision="highest")
        return y * scale

    # 1) Module-faithful init: lora_B is zero => output must be exactly zero.
    lora_A, lora_B0 = init_lora_params(ka, in_dim, bottle_dim, dtype=jnp.float32)
    out0 = jax.block_until_ready(lora_forward(x, lora_A, lora_B0))
    assert out0.shape == x.shape
    assert jnp.allclose(out0, 0.0)

    # 2) Non-trivial weights for a real numeric check.
    lora_B = 0.1 * jax.random.normal(kb, (bottle_dim, in_dim), dtype=jnp.float32)
    ref = ref_lora(x, lora_A, lora_B, scaling)
    out = jax.block_until_ready(jax.jit(lora_forward)(x, lora_A, lora_B))
    assert out.shape == x.shape
    assert jnp.allclose(out, ref, atol=2e-3, rtol=2e-2)

    # 3) Fused residual variant: out = base + LoRA delta (base aliased to output).
    base = jax.random.normal(kbase, x.shape, dtype=jnp.float32)
    out_fused = jax.block_until_ready(
        jax.jit(lambda a, A, B, b: lora_forward(a, A, B, base=b))(x, lora_A, lora_B, base))
    assert jnp.allclose(out_fused, base + ref, atol=2e-3, rtol=2e-2)

    # 4) Ragged M (M=10, tm=8): last tile masked by Pallas, no pad/slice copies.
    x_rag = jax.random.normal(kx2, (10, in_dim), dtype=jnp.float32)
    out_rag = jax.block_until_ready(lora_forward(x_rag, lora_A, lora_B, tm=8))
    assert jnp.allclose(out_rag, ref_lora(x_rag, lora_A, lora_B, scaling),
                        atol=2e-3, rtol=2e-2)

    # 5) bf16 I/O path (f32 accumulation inside the kernel).
    xb, Ab, Bb = (x.astype(jnp.bfloat16), lora_A.astype(jnp.bfloat16),
                  lora_B.astype(jnp.bfloat16))
    out_bf16 = jax.block_until_ready(lora_forward(xb, Ab, Bb))
    ref_bf16 = ref_lora(xb, Ab, Bb, scaling)
    assert jnp.allclose(out_bf16.astype(jnp.float32), ref_bf16, atol=1e-2, rtol=1e-1)

    # 6) 2-D (N-tiled) path, exercised explicitly via tn (auto-enabled for very
    #    large in_dim, e.g. on v7x); also exercises a ragged row axis.
    in_dim2 = 256
    A2 = 0.1 * jax.random.normal(ka, (in_dim2, bottle_dim), dtype=jnp.float32)
    B2 = 0.1 * jax.random.normal(kb2, (bottle_dim, in_dim2), dtype=jnp.float32)
    x2 = jax.random.normal(kx, (3, 6, in_dim2), dtype=jnp.float32)   # M = 18
    ref2 = ref_lora(x2, A2, B2, scaling)
    out2 = jax.block_until_ready(lora_forward(x2, A2, B2, tm=8, tn=128))
    assert jnp.allclose(out2, ref2, atol=2e-3, rtol=2e-2)
    base2 = jax.random.normal(kbase, x2.shape, dtype=jnp.float32)
    out2f = jax.block_until_ready(lora_forward(x2, A2, B2, base=base2, tm=8, tn=128))
    assert jnp.allclose(out2f, base2 + ref2, atol=2e-3, rtol=2e-2)

    print("KERNEL_OK")
</pallas_src>

<mosaic_0001>
module attributes {stable_mosaic.version = 11 : i64} {
  func.func @_lora_kernel(%arg0: i32, %arg1: memref<8x32xf32, #tpu.memory_space<vmem>>, %arg2: memref<32x8xf32, #tpu.memory_space<vmem>>, %arg3: memref<8x32xf32, #tpu.memory_space<vmem>>, %arg4: memref<8x32xf32, #tpu.memory_space<vmem>>) attributes {dimension_semantics = [#tpu.dimension_semantics<parallel>], iteration_bounds = array<i64: 2>, scalar_prefetch = 0 : i64, scratch_operands = 0 : i64, tpu.core_type = #tpu.core_type<tc>, window_params = [{transform_indices = @transform_0, window_bounds = array<i64: 8, 32>}, {pipeline_mode = #tpu.pipeline_mode<synchronous>, transform_indices = @transform_1, window_bounds = array<i64: 32, 8>}, {pipeline_mode = #tpu.pipeline_mode<synchronous>, transform_indices = @transform_2, window_bounds = array<i64: 8, 32>}, {transform_indices = @transform_3, window_bounds = array<i64: 8, 32>}]} {
    %c0 = arith.constant 0 : index
    %c0_0 = arith.constant 0 : index
    %0 = vector.load %arg1[%c0, %c0_0] : memref<8x32xf32, #tpu.memory_space<vmem>>, vector<8x32xf32>
    %c0_1 = arith.constant 0 : index
    %c0_2 = arith.constant 0 : index
    %1 = vector.load %arg2[%c0_1, %c0_2] : memref<32x8xf32, #tpu.memory_space<vmem>>, vector<32x8xf32>
    %cst = arith.constant dense<0.000000e+00> : vector<8x8xf32>
    %2 = tpu.matmul %0, %1, %cst {dimension_numbers = #tpu.dot_dimension_numbers<[1], [0], [0], [1], [0, 0, 1, 1], [], []>} : vector<8x32xf32>, vector<32x8xf32>, vector<8x8xf32> -> vector<8x8xf32>
    %cst_3 = arith.constant 1.250000e-01 : f32
    %3 = vector.broadcast %cst_3 : f32 to vector<8x8xf32>
    %4 = arith.mulf %2, %3 : vector<8x8xf32>
    %c0_4 = arith.constant 0 : index
    %c0_5 = arith.constant 0 : index
    %5 = vector.load %arg3[%c0_4, %c0_5] : memref<8x32xf32, #tpu.memory_space<vmem>>, vector<8x32xf32>
    %cst_6 = arith.constant dense<0.000000e+00> : vector<8x32xf32>
    %6 = tpu.matmul %4, %5, %cst_6 {dimension_numbers = #tpu.dot_dimension_numbers<[1], [0], [0], [1], [0, 0, 1, 1], [], []>} : vector<8x8xf32>, vector<8x32xf32>, vector<8x32xf32> -> vector<8x32xf32>
    %c0_7 = arith.constant 0 : index
    %c0_8 = arith.constant 0 : index
    %7 = vector.load %arg4[%c0_7, %c0_8] : memref<8x32xf32, #tpu.memory_space<vmem>>, vector<8x32xf32>
    tpu.vector_store %arg4[%c0_7, %c0_8], %6 {strides = array<i32>} : memref<8x32xf32, #tpu.memory_space<vmem>>, vector<8x32xf32>,
    return
  }
  func.func @transform_0(%arg0: i32) -> (i32, i32) {
    %c0_i32 = arith.constant 0 : i32
    %c0_i32_0 = arith.constant 0 : i32
    return %arg0, %c0_i32 : i32, i32
  }
  func.func @transform_1(%arg0: i32) -> (i32, i32) {
    %c0_i32 = arith.constant 0 : i32
    %c0_i32_0 = arith.constant 0 : i32
    %c0_i32_1 = arith.constant 0 : i32
    return %c0_i32, %c0_i32_0 : i32, i32
  }
  func.func @transform_2(%arg0: i32) -> (i32, i32) {
    %c0_i32 = arith.constant 0 : i32
    %c0_i32_0 = arith.constant 0 : i32
    %c0_i32_1 = arith.constant 0 : i32
    return %c0_i32, %c0_i32_0 : i32, i32
  }
  func.func @transform_3(%arg0: i32) -> (i32, i32) {
    %c0_i32 = arith.constant 0 : i32
    %c0_i32_0 = arith.constant 0 : i32
    return %arg0, %c0_i32 : i32, i32
  }
}

</mosaic_0001>

<bundles_post_ra>
// kernel: tpu_custom_call.1
= control target key start
LH: loop header
LB: loop body
LE: loop exit
PB: predicated region body
PF: predicated region fallthrough
CT: control target
= control target key end

     0   :  { %8 = vsyncpa [#allocation3], 0  ;;  %s683_s0 = inlined_call_operand.vmem [shape: f32[16,32], index: 0, kind: input, shape index: {}]   ;;  %s684_s1 = inlined_call_operand.vmem [shape: f32[32,8], index: 1, kind: input, shape index: {}]   ;;  %s685_s2 = inlined_call_operand.vmem [shape: f32[8,32], index: 2, kind: input, shape index: {}]   ;;  %s686_s3 = inlined_call_operand.hbm [shape: f32[16,32], index: 3, kind: output, shape index: {}]  }
   0x1   :  { %10 = vsyncpa [#allocation3 + $0x1], 0  ;;  %s566_s12 = smov 0   ;;  %s568_s13 = smov 0  }
   0x2   :  { %s570_s14 = smov 0   ;;  %s572_s15 = smov 0  }
   0x3 LB: > { %s587_s16 = sadd.s32 4294967295, %s540_s15   ;;  %s395_s17 = sadd.s32 4294967294, %s540_s15   ;;  %s540_s15 = sphi %s572_s15, %s692_s15   ;;  %s536_s14 = sphi %s570_s14, %s691_s14   ;;  %s532_s13 = sphi %s568_s13, %s690_s13   ;;  %s528_s12 = sphi %s566_s12, %s689_s12  }
   0x4   : > { %s591_s18 = sadd.s32 1, %s540_s15   ;;  %s91_s19 = sadd.s32 1, %s536_s14 }
   0x5   : > { %s88_s20 = ssub.s32 %s540_s15, %s591_s18  ;;  %p101_p0 = scmp.ne.s32.totalorder %s536_s14, %s532_s13 }
   0x6   : > { %p89_p1 = scmp.eq.s32.totalorder %s88_s20, 0  ;;  %p102_p2 = scmp.eq.s32.totalorder %s587_s16, 1 }
   0x7   : > { %p107_p3 = scmp.ne.s32.totalorder %s532_s13, %s528_s12  ;;  %p108_p4 = scmp.eq.s32.totalorder %s395_s17, 1 }
   0x8   : > { %s602_s21 = scalar_select %p89_p1, %s536_s14, %s91_s19  }
   0x9   : > { %p604_p5 = por %p102_p2, %p101_p0  ;;  %p608_p6 = por %p108_p4, %p107_p3 }
   0xa   : > { %p398_p7 = scmp.ge.s32.totalorder %s540_s15, 1  ;;  %p139_p8 = scmp.lt.s32.totalorder %s540_s15, 3 }
   0xc   : > { %p140_p9 = pnand %p398_p7, %p139_p8 }
   0xd   : > { %v167_v0 = vld [vmem:[%s684_s1] sm:$0xff] (!%p140_p9)  ;;  %v168_v1 = vld [vmem:[%s684_s1 + $0x8] sm:$0xff] (!%p140_p9)  ;;  %v169_v2 = vld [vmem:[%s684_s1 + $0x10] sm:$0xff] (!%p140_p9)  ;;  %v542_v3 = vmov (!%p140_p9), 0.0|0.0   ;;  %vm543_vm0 = vmmov (!%p140_p9), 0   ;;  %v544_v6 = vmov (!%p140_p9), 0.0  }
   0xe   : > { %143 = sbr.rel (%p140_p9) target bundleno = 466 (0x1d2), region = 32  ;;  %430 = vmatprep.subr.bf16.mxu0 (!%p140_p9), %v542_v3  ;;  %v431_v4 = vpack.c.bf16 (!%p140_p9), %v168_v1, %v167_v0  ;;  %v170_v5 = vld [vmem:[%s684_s1 + $0x18] sm:$0xff] (!%p140_p9)  ;;  %422 = vmatprep.mubr.msk.f32.mxu0 (!%p140_p9), %vm543_vm0, %v544_v6  ;;  %p162_p10 = scmp.lt.s32.totalorder (!%p140_p9), %s587_s16, 1  ;;  %vm171_vm1 = vcmask (!%p140_p9), 261120   ;;  %v246_v9 = vld [vmem:[%s685_s2] sm:$0xff] (!%p140_p9)  ;;  %vm247_vm2 = vcmask (!%p140_p9), 64512  }
   0xf   : > { %425 = vmatprep.subr.mxu1 (!%p140_p9), %v544_v6  ;;  %427 = vmatprep.mubr.msk.f32.mxu1 (!%p140_p9), %vm543_vm0, %v544_v6  ;;  %v434_v7 = vpack.c.bf16 (!%p140_p9), %v170_v5, %v169_v2  ;;  %s159_s17 = sand.u32 (!%p140_p9), 1, %s532_s13   ;;  %s404_s20 = sshll.u32 (!%p140_p9), %s587_s16, 7 }
  0x10   : > { %432 = vmatpush3.bf16.msra.mxu0 (!%p140_p9), %v431_v4  ;;  %426 = vmatpush3.msra.mxu1 (!%p140_p9), %v246_v9  ;;  %s399_s19 = sshll.u32 (!%p140_p9), %s159_s17, 3  ;;  %s640_s28 = scalar_lea.hbm (!%p140_p9), %s686_s3, %s404_s20 }
  0x11   : > { %433 = vmatprep.subr.bf16.mxu0 (!%p140_p9), %v542_v3  ;;  %s161_s24 = scalar_lea.vmem (!%p140_p9), [#allocation2], %s399_s19  ;;  %s323_s29 = scalar_lea.sflag (!%p140_p9), [#allocation3], %s159_s17 }
  0x12   : > { %s336_s25 = sshll.u32 (!%p140_p9), %s161_s24, 4  ;;  %s642_s25 = int_to_ptr.vmem [resolvable:$true] %s336_s25 }
  0x13   : > { %s478_s30 = scalar_lea.vmem (!%p140_p9), %s642_s25, 128 }
  0x14   : > { %435 = vmatpush3.bf16.msra.mxu0 (!%p140_p9), %v434_v7  ;;  %p479_p11 = scmp.ne.s32.totalorder (!%p140_p9), %s642_s25, %s478_s30 }
  0x15   : > { %s163_s5 = scalar_select %p162_p10, %s587_s16, 1 }
  0x16   : > { %p480_p12 = pnand %p479_p11, %p604_p5  ;;  %s545_s16 = smov [#allocation2]  }
  0x17   : > { %s400_s6 = sshll.u32 %s163_s5, 3  ;;  %s482_s4 = sshll.u32 %s545_s16, 4  ;;  %s483_s4 = int_to_ptr.vmem [resolvable:$false] %s482_s4 }
  0x18   : > { %s165_s9 = scalar_lea.vmem %s683_s0, %s400_s6  ;;  %p481_p13 = pneg %p480_p12 }
  0x19   : > { %v166_v8 = vld [vmem:[%s165_s9] sm:$0xff]  ;;  %s484_s5 = scalar_lea.vmem %s483_s4, 256  ;;  %p485_p0 = scmp.lt.s32.totalorder %s642_s25, %s483_s4 }
  0x1a   : > { %423 = vmatmul.mubr.msk.f32.vlgmr.msra.gmra.mrb[0].mxu0 %vm171_vm1, %v166_v8  ;;  %p486_p1 = scmp.lt.s32.totalorder %s484_s5, %s478_s30 }
  0x1c   : > { %p487_p2 = por %p486_p1, %p485_p0 }
  0x1e   : > { %p488_p3 = pnand %p487_p2, %p481_p13 }
  0xed   : > { %v241_v10 = vpop.f32.mrb[0].mxu0 }
  0xee   : > { %v245_v11 = vmul.f32 0.125, %v241_v10  ;;  %v424_v12 = vpop.f32.mrb[1].mxu0 }
  0xf0   : > { %428 = vmatmul.mubr.msk.f32.vlgmr.msra.gmra.mrb[0].mxu1 %vm247_vm2, %v245_v11 }
 0x1c3   : > { %v317_v13 = vpop.f32.mrb[0].mxu1 }
 0x1c4   : > { %321 = vst.msk [vmem:[%s161_s24] sm:$0xff] %vm171_vm1, %v317_v13  ;;  %v429_v14 = vpop.f32.mrb[1].mxu1 }
 0x1c5   : > { %491 = shalt.err (!%p488_p3)
}
 0x1c6   : > { %s492_s6 = scalar_lea.hbm %s640_s28, 128  ;;  %s496_s9 = scalar_lea.hbm %s686_s3, 256 }
 0x1c7   : > { %p493_p4 = scmp.ne.s32.totalorder %s640_s28, %s492_s6  ;;  %p497_p9 = scmp.lt.u32.totalorder %s640_s28, %s686_s3 }
 0x1c8   : > { %p498_p10 = scmp.lt.u32.totalorder %s496_s9, %s492_s6  ;;  %p500_p12 = scmp.lt.u32.totalorder %s492_s6, %s640_s28 }
 0x1c9   : > { %p494_p7 = pnand %p493_p4, %p604_p5 }
 0x1ca   : > { %p499_p11 = por %p498_p10, %p497_p9 }
 0x1cb   : > { %p495_p8 = pneg %p494_p7 }
 0x1cc   : > { %p501_p13 = por %p500_p12, %p499_p11 }
 0x1ce   : > { %p502_p0 = pnand %p501_p13, %p495_p8 }
 0x1d0   : > { %505 = shalt.err (!%p502_p0)
}
 0x1d1   : > { %436 = dma.vmem_to_hbm [thread:$0]  (%p604_p5), %s642_s25, 128, %s640_s28, %s323_s29  }
 0x1d2 PF: > { %p442_p1 = scmp.ge.s32.totalorder %s540_s15, 2  ;;  %s348_s17 = sand.u32 1, %s528_s12  }
 0x1d3   : > { %s349_s19 = scalar_lea.sflag [#allocation3], %s348_s17 }
 0x1d4   : > { %p439_p2 = pnand %p442_p1, %p608_p6 }
 0x1d6   : > { %523 = dma.done.wait (!%p439_p2), %s349_s19, 128  }
 0x1d7   : > { %525 = vsyncadd (!%p439_p2), %s349_s19, 4294967168  ;;  %p13_p3 = scmp.ge.s32.totalorder %s591_s18, 4   ;;  %s689_s12 = smov %s532_s13 }
 0x1d8   : > { %s690_s13 = smov %s536_s14  ;;  %s691_s14 = smov %s602_s21 }
 0x1d9   : > { %s692_s15 = smov %s591_s18  ;;  %15 = sbr.rel (!%p13_p3) target bundleno = 3 (0x3), region = 67 }
 0x1e0   :  { %354 = vsyncpa [#allocation3], 1 }
 0x1e1   :  { %356 = vsyncpa [#allocation3 + $0x1], 1 }

</bundles_post_ra>
